<compile_context>
chip_gen: v7x
topology: tpu7x:2x2x1
jax: 0.10.0
libtpu: 0.0.40
codegen_flags: <defaults>
</compile_context>

<pallas_src>
import jax
import jax.numpy as jnp
import numpy as np
from jax.experimental import pallas as pl
from jax.experimental.pallas import tpu as pltpu

_EPS = 1e-5
_LANE = 128

# Whole-array-in-VMEM spec (tiny shapes; no tiling grid needed).
_VMEM = pl.BlockSpec(memory_space=pltpu.MemorySpace.VMEM)


# ----------------------------- kernel -------------------------------------- #

def _mlp_block(v, w1, gamma, beta, w2, b2):
    """Linear(no bias) -> BatchNorm1d(train, two-pass stats) -> ReLU -> Linear(bias).

    Weights arrive pre-cast to bf16; activations are cast to bf16 only at the
    MXU inputs; all elementwise BN/ReLU/bias math stays in f32.
    """
    h = jnp.dot(v.astype(jnp.bfloat16), w1, preferred_element_type=jnp.float32)
    inv_n = 1.0 / h.shape[0]
    mean = jnp.sum(h, axis=0, keepdims=True) * inv_n
    d = h - mean
    var = jnp.sum(d * d, axis=0, keepdims=True) * inv_n       # biased, two-pass
    hn = d * jax.lax.rsqrt(var + _EPS) * gamma + beta
    hr = jnp.maximum(hn, 0.0)                                  # ReLU
    return jnp.dot(hr.astype(jnp.bfloat16), w2,
                   preferred_element_type=jnp.float32) + b2


def _siamese_arm_kernel(x_ref, wenc_ref, wstk_ref, vstk_ref, out_ref):
    """Fused encoder + projector + predictor.

    x_ref    : (B, C*H*W)      f32
    wenc_ref : (C*H*W, D_P)    bf16   (GAP's 1/(H*W) folded in)
    wstk_ref : (4, D_P, D_P)   bf16   [proj_w1, proj_w2, pred_w1, pred_w2]
    vstk_ref : (8, D_P)        f32    rows: [p_gamma, p_beta, p_b2,
                                             q_gamma, q_beta, q_b2, 0, 0]
    out_ref  : (B, 3*D_P)      f32    [ y | z | h ]
    """
    d_p = wenc_ref.shape[1]

    # Encoder: GAP + Linear fused into one MXU matmul.
    y = jnp.dot(x_ref[...].astype(jnp.bfloat16), wenc_ref[...],
                preferred_element_type=jnp.float32)            # (B, D_P)

    # Projector MLP.
    z = _mlp_block(y,
                   wstk_ref[0], vstk_ref[0:1, :], vstk_ref[1:2, :],
                   wstk_ref[1], vstk_ref[2:3, :])              # (B, D_P)

    # Predictor MLP.
    h = _mlp_block(z,
                   wstk_ref[2], vstk_ref[3:4, :], vstk_ref[4:5, :],
                   wstk_ref[3], vstk_ref[5:6, :])              # (B, D_P)

    # Single lane-dense output slab; all stores are 128-lane aligned, unmasked.
    out_ref[:, 0:d_p] = y
    out_ref[:, d_p:2 * d_p] = z
    out_ref[:, 2 * d_p:3 * d_p] = h


# ----------------------------- padding helpers ------------------------------ #

def _round_up(n, m):
    return ((n + m - 1) // m) * m


def _pad_last(a, target):
    pad = target - a.shape[-1]
    if pad == 0:
        return a
    widths = [(0, 0)] * (a.ndim - 1) + [(0, pad)]
    return jnp.pad(a, widths)


def _pad_axis0(a, target):
    pad = target - a.shape[0]
    if pad == 0:
        return a
    widths = [(0, pad)] + [(0, 0)] * (a.ndim - 1)
    return jnp.pad(a, widths)


# ----------------------------- one-time param prep -------------------------- #

def prepare_params(enc_w, projector_params, predictor_params, spatial_hw):
    """One-time preparation: GAP fold, zero-pad to a common lane-dense width,
    stack into slabs, pre-cast MXU weights to bf16.  Zero padding is exact:
    padded input lanes hit zero weight rows; padded hidden columns stay zero
    through BN (gamma=beta=0 there) and ReLU; padded output lanes are sliced
    off by the wrapper."""
    input_dim = enc_w.shape[1]
    hid_proj = projector_params[0].shape[1]
    out_dim = projector_params[3].shape[1]
    hid_pred = predictor_params[0].shape[1]
    d_p = _round_up(max(input_dim, hid_proj, out_dim, hid_pred), _LANE)

    # Encoder weight expanded so GAP becomes part of the matmul:
    # wenc_big[c*HW + s, :] = enc_w[c, :] / HW.
    wenc_big = jnp.repeat(enc_w * (1.0 / spatial_hw), spatial_hw, axis=0)
    wenc_big = _pad_last(wenc_big, d_p).astype(jnp.bfloat16)        # (C*HW, D_P)

    def pad_w(w):
        return _pad_last(_pad_axis0(w, d_p), d_p)

    pw1, pg, pbt, pw2, pb2 = projector_params
    qw1, qg, qbt, qw2, qb2 = predictor_params

    wstack = jnp.stack([pad_w(pw1), pad_w(pw2),
                        pad_w(qw1), pad_w(qw2)]).astype(jnp.bfloat16)  # (4,D_P,D_P)

    rows = [pg, pbt, pb2, qg, qbt, qb2]
    vstack = jnp.concatenate(
        [_pad_last(r.reshape(1, -1).astype(jnp.float32), d_p) for r in rows]
        + [jnp.zeros((2, d_p), jnp.float32)], axis=0)                 # (8, D_P)

    dims = dict(input_dim=input_dim, out_dim=out_dim, d_p=d_p)
    return (wenc_big, wstack, vstack), dims


# ----------------------------- forward wrapper ------------------------------ #

def make_siamese_arm_forward(dims):
    d_p = dims["d_p"]
    din = dims["input_dim"]
    dout = dims["out_dim"]

    @jax.jit
    def forward(x, wenc_big, wstack, vstack):
        b = x.shape[0]
        x_flat = x.reshape(b, -1)                                     # (B, C*H*W)
        out = pl.pallas_call(
            _siamese_arm_kernel,
            out_shape=jax.ShapeDtypeStruct((b, 3 * d_p), jnp.float32),
            in_specs=[_VMEM, _VMEM, _VMEM, _VMEM],
            out_specs=_VMEM,
        )(x_flat, wenc_big, wstack, vstack)
        y = out[:, :din]
        z = out[:, d_p:d_p + dout]
        h = out[:, 2 * d_p:2 * d_p + dout]
        return y, z, h

    return forward


# ----------------------------- pure-JAX reference --------------------------- #

def _reference_forward(x, enc_w, projector_params, predictor_params):
    """Same numeric recipe as the kernel (GAP-folded bf16 MXU matmuls, two-pass
    BatchNorm in f32), no Pallas."""
    b, c, hh, ww = x.shape
    hw = hh * ww
    x_flat = x.reshape(b, c * hw)
    wenc_big = jnp.repeat(enc_w * (1.0 / hw), hw, axis=0).astype(jnp.bfloat16)
    y = jnp.dot(x_flat.astype(jnp.bfloat16), wenc_big,
                preferred_element_type=jnp.float32)

    def mlp(v, params):
        w1, gamma, beta, w2, b2 = params
        h = jnp.dot(v.astype(jnp.bfloat16), w1.astype(jnp.bfloat16),
                    preferred_element_type=jnp.float32)
        inv_n = 1.0 / h.shape[0]
        mean = jnp.sum(h, axis=0, keepdims=True) * inv_n
        d = h - mean
        var = jnp.sum(d * d, axis=0, keepdims=True) * inv_n
        hn = d * jax.lax.rsqrt(var + _EPS) * gamma + beta
        hr = jnp.maximum(hn, 0.0)
        return jnp.dot(hr.astype(jnp.bfloat16), w2.astype(jnp.bfloat16),
                       preferred_element_type=jnp.float32) + b2

    z = mlp(y, projector_params)
    h = mlp(z, predictor_params)
    return y, z, h


# ----------------------------- param init ----------------------------------- #

def init_mlp_params(key, input_dim, hidden_size, output_dim):
    k1, k2, k3 = jax.random.split(key, 3)
    w1 = jax.random.normal(k1, (input_dim, hidden_size), jnp.float32) / jnp.sqrt(
        jnp.float32(input_dim))
    gamma = jnp.ones((1, hidden_size), jnp.float32)   # BatchNorm1d init
    beta = jnp.zeros((1, hidden_size), jnp.float32)
    w2 = jax.random.normal(k2, (hidden_size, output_dim), jnp.float32) / jnp.sqrt(
        jnp.float32(hidden_size))
    b2 = (jax.random.uniform(k3, (1, output_dim), jnp.float32, -1.0, 1.0)
          / jnp.sqrt(jnp.float32(hidden_size)))
    return (w1, gamma, beta, w2, b2)


if __name__ == "__main__":
    # Small shapes consistent with the module's forward.
    B, C, H, W = 2, 4, 16, 16
    INPUT_DIM, HIDDEN, OUTPUT_DIM = 32, 64, 16

    key = jax.random.PRNGKey(0)
    kx, kenc, kproj, kpred = jax.random.split(key, 4)

    x = jax.random.normal(kx, (B, C, H, W), jnp.float32)              # NCHW
    enc_w = jax.random.normal(kenc, (C, INPUT_DIM), jnp.float32) / jnp.sqrt(
        jnp.float32(C))
    projector_params = init_mlp_params(kproj, INPUT_DIM, HIDDEN, OUTPUT_DIM)
    predictor_params = init_mlp_params(kpred, OUTPUT_DIM, HIDDEN, OUTPUT_DIM)

    # One-time parameter preparation (padding / GAP fold / bf16 cast / packing).
    (wenc_big, wstack, vstack), dims = prepare_params(
        enc_w, projector_params, predictor_params, spatial_hw=H * W)
    wenc_big, wstack, vstack = jax.block_until_ready((wenc_big, wstack, vstack))

    forward = make_siamese_arm_forward(dims)
    y, z, h = forward(x, wenc_big, wstack, vstack)
    jax.block_until_ready((y, z, h))

    assert y.shape == (B, INPUT_DIM)
    assert z.shape == (B, OUTPUT_DIM)
    assert h.shape == (B, OUTPUT_DIM)

    # Sanity check against a pure-JAX reference of the same math.
    y_r, z_r, h_r = jax.jit(_reference_forward)(
        x, enc_w, projector_params, predictor_params)
    jax.block_until_ready((y_r, z_r, h_r))
    np.testing.assert_allclose(np.asarray(y), np.asarray(y_r), rtol=5e-2, atol=5e-3)
    np.testing.assert_allclose(np.asarray(z), np.asarray(z_r), rtol=5e-2, atol=5e-3)
    np.testing.assert_allclose(np.asarray(h), np.asarray(h_r), rtol=5e-2, atol=5e-3)

    print("KERNEL_OK")
</pallas_src>

<mosaic_0001>
module attributes {stable_mosaic.version = 11 : i64} {
  func.func @_siamese_arm_kernel(%arg0: memref<2x1024xf32, #tpu.memory_space<vmem>>, %arg1: memref<1024x128xbf16, #tpu.memory_space<vmem>>, %arg2: memref<4x128x128xbf16, #tpu.memory_space<vmem>>, %arg3: memref<8x128xf32, #tpu.memory_space<vmem>>, %arg4: memref<2x384xf32, #tpu.memory_space<vmem>>) attributes {dimension_semantics = [], scalar_prefetch = 0 : i64, scratch_operands = 0 : i64, tpu.core_type = #tpu.core_type<tc>} {
    %c0 = arith.constant 0 : index
    %c0_0 = arith.constant 0 : index
    %0 = vector.load %arg0[%c0, %c0_0] : memref<2x1024xf32, #tpu.memory_space<vmem>>, vector<2x1024xf32>
    %1 = arith.truncf %0 : vector<2x1024xf32> to vector<2x1024xbf16>
    %c0_1 = arith.constant 0 : index
    %c0_2 = arith.constant 0 : index
    %2 = vector.load %arg1[%c0_1, %c0_2] : memref<1024x128xbf16, #tpu.memory_space<vmem>>, vector<1024x128xbf16>
    %cst = arith.constant dense<0.000000e+00> : vector<2x128xf32>
    %3 = tpu.matmul %1, %2, %cst {dimension_numbers = #tpu.dot_dimension_numbers<[1], [0], [0], [1], [0, 0, 1, 1], [], []>} : vector<2x1024xbf16>, vector<1024x128xbf16>, vector<2x128xf32> -> vector<2x128xf32>
    %c0_3 = arith.constant 0 : index
    %c0_4 = arith.constant 0 : index
    %c0_5 = arith.constant 0 : index
    %4 = vector.load %arg2[%c0_3, %c0_4, %c0_5] : memref<4x128x128xbf16, #tpu.memory_space<vmem>>, vector<1x128x128xbf16>
    %5 = vector.shape_cast %4 : vector<1x128x128xbf16> to vector<128x128xbf16>
    %c0_6 = arith.constant 0 : index
    %c0_7 = arith.constant 0 : index
    %6 = vector.load %arg3[%c0_6, %c0_7] : memref<8x128xf32, #tpu.memory_space<vmem>>, vector<1x128xf32>
    %c1 = arith.constant 1 : index
    %c0_8 = arith.constant 0 : index
    %7 = vector.load %arg3[%c1, %c0_8] : memref<8x128xf32, #tpu.memory_space<vmem>>, vector<1x128xf32>
    %c1_9 = arith.constant 1 : index
    %c0_10 = arith.constant 0 : index
    %c0_11 = arith.constant 0 : index
    %8 = vector.load %arg2[%c1_9, %c0_10, %c0_11] : memref<4x128x128xbf16, #tpu.memory_space<vmem>>, vector<1x128x128xbf16>
    %9 = vector.shape_cast %8 : vector<1x128x128xbf16> to vector<128x128xbf16>
    %c2 = arith.constant 2 : index
    %c0_12 = arith.constant 0 : index
    %10 = vector.load %arg3[%c2, %c0_12] : memref<8x128xf32, #tpu.memory_space<vmem>>, vector<1x128xf32>
    %11 = arith.truncf %3 : vector<2x128xf32> to vector<2x128xbf16>
    %cst_13 = arith.constant dense<0.000000e+00> : vector<2x128xf32>
    %12 = tpu.matmul %11, %5, %cst_13 {dimension_numbers = #tpu.dot_dimension_numbers<[1], [0], [0], [1], [0, 0, 1, 1], [], []>} : vector<2x128xbf16>, vector<128x128xbf16>, vector<2x128xf32> -> vector<2x128xf32>
    %cst_14 = arith.constant dense<0.000000e+00> : vector<128xf32>
    %13 = vector.multi_reduction <add>, %12, %cst_14 [0] : vector<2x128xf32> to vector<128xf32>
    %14 = vector.shape_cast %13 : vector<128xf32> to vector<1x128xf32>
    %cst_15 = arith.constant 5.000000e-01 : f32
    %15 = vector.broadcast %cst_15 : f32 to vector<1x128xf32>
    %16 = arith.mulf %14, %15 : vector<1x128xf32>
    %17 = vector.broadcast %16 : vector<1x128xf32> to vector<2x128xf32>
    %18 = arith.subf %12, %17 : vector<2x128xf32>
    %19 = arith.mulf %18, %18 : vector<2x128xf32>
    %cst_16 = arith.constant dense<0.000000e+00> : vector<128xf32>
    %20 = vector.multi_reduction <add>, %19, %cst_16 [0] : vector<2x128xf32> to vector<128xf32>
    %21 = vector.shape_cast %20 : vector<128xf32> to vector<1x128xf32>
    %cst_17 = arith.constant 5.000000e-01 : f32
    %22 = vector.broadcast %cst_17 : f32 to vector<1x128xf32>
    %23 = arith.mulf %21, %22 : vector<1x128xf32>
    %cst_18 = arith.constant 9.99999974E-6 : f32
    %24 = vector.broadcast %cst_18 : f32 to vector<1x128xf32>
    %25 = arith.addf %23, %24 : vector<1x128xf32>
    %26 = math.rsqrt %25 : vector<1x128xf32>
    %27 = vector.broadcast %26 : vector<1x128xf32> to vector<2x128xf32>
    %28 = arith.mulf %18, %27 : vector<2x128xf32>
    %29 = vector.broadcast %6 : vector<1x128xf32> to vector<2x128xf32>
    %30 = arith.mulf %28, %29 : vector<2x128xf32>
    %31 = vector.broadcast %7 : vector<1x128xf32> to vector<2x128xf32>
    %32 = arith.addf %30, %31 : vector<2x128xf32>
    %cst_19 = arith.constant 0.000000e+00 : f32
    %33 = vector.broadcast %cst_19 : f32 to vector<2x128xf32>
    %34 = arith.maximumf %32, %33 : vector<2x128xf32>
    %35 = arith.truncf %34 : vector<2x128xf32> to vector<2x128xbf16>
    %cst_20 = arith.constant dense<0.000000e+00> : vector<2x128xf32>
    %36 = tpu.matmul %35, %9, %cst_20 {dimension_numbers = #tpu.dot_dimension_numbers<[1], [0], [0], [1], [0, 0, 1, 1], [], []>} : vector<2x128xbf16>, vector<128x128xbf16>, vector<2x128xf32> -> vector<2x128xf32>
    %37 = vector.broadcast %10 : vector<1x128xf32> to vector<2x128xf32>
    %38 = arith.addf %36, %37 : vector<2x128xf32>
    %c2_21 = arith.constant 2 : index
    %c0_22 = arith.constant 0 : index
    %c0_23 = arith.constant 0 : index
    %39 = vector.load %arg2[%c2_21, %c0_22, %c0_23] : memref<4x128x128xbf16, #tpu.memory_space<vmem>>, vector<1x128x128xbf16>
    %40 = vector.shape_cast %39 : vector<1x128x128xbf16> to vector<128x128xbf16>
    %c3 = arith.constant 3 : index
    %c0_24 = arith.constant 0 : index
    %41 = vector.load %arg3[%c3, %c0_24] : memref<8x128xf32, #tpu.memory_space<vmem>>, vector<1x128xf32>
    %c4 = arith.constant 4 : index
    %c0_25 = arith.constant 0 : index
    %42 = vector.load %arg3[%c4, %c0_25] : memref<8x128xf32, #tpu.memory_space<vmem>>, vector<1x128xf32>
    %c3_26 = arith.constant 3 : index
    %c0_27 = arith.constant 0 : index
    %c0_28 = arith.constant 0 : index
    %43 = vector.load %arg2[%c3_26, %c0_27, %c0_28] : memref<4x128x128xbf16, #tpu.memory_space<vmem>>, vector<1x128x128xbf16>
    %44 = vector.shape_cast %43 : vector<1x128x128xbf16> to vector<128x128xbf16>
    %c5 = arith.constant 5 : index
    %c0_29 = arith.constant 0 : index
    %45 = vector.load %arg3[%c5, %c0_29] : memref<8x128xf32, #tpu.memory_space<vmem>>, vector<1x128xf32>
    %46 = arith.truncf %38 : vector<2x128xf32> to vector<2x128xbf16>
    %cst_30 = arith.constant dense<0.000000e+00> : vector<2x128xf32>
    %47 = tpu.matmul %46, %40, %cst_30 {dimension_numbers = #tpu.dot_dimension_numbers<[1], [0], [0], [1], [0, 0, 1, 1], [], []>} : vector<2x128xbf16>, vector<128x128xbf16>, vector<2x128xf32> -> vector<2x128xf32>
    %cst_31 = arith.constant dense<0.000000e+00> : vector<128xf32>
    %48 = vector.multi_reduction <add>, %47, %cst_31 [0] : vector<2x128xf32> to vector<128xf32>
    %49 = vector.shape_cast %48 : vector<128xf32> to vector<1x128xf32>
    %cst_32 = arith.constant 5.000000e-01 : f32
    %50 = vector.broadcast %cst_32 : f32 to vector<1x128xf32>
    %51 = arith.mulf %49, %50 : vector<1x128xf32>
    %52 = vector.broadcast %51 : vector<1x128xf32> to vector<2x128xf32>
    %53 = arith.subf %47, %52 : vector<2x128xf32>
    %54 = arith.mulf %53, %53 : vector<2x128xf32>
    %cst_33 = arith.constant dense<0.000000e+00> : vector<128xf32>
    %55 = vector.multi_reduction <add>, %54, %cst_33 [0] : vector<2x128xf32> to vector<128xf32>
    %56 = vector.shape_cast %55 : vector<128xf32> to vector<1x128xf32>
    %cst_34 = arith.constant 5.000000e-01 : f32
    %57 = vector.broadcast %cst_34 : f32 to vector<1x128xf32>
    %58 = arith.mulf %56, %57 : vector<1x128xf32>
    %cst_35 = arith.constant 9.99999974E-6 : f32
    %59 = vector.broadcast %cst_35 : f32 to vector<1x128xf32>
    %60 = arith.addf %58, %59 : vector<1x128xf32>
    %61 = math.rsqrt %60 : vector<1x128xf32>
    %62 = vector.broadcast %61 : vector<1x128xf32> to vector<2x128xf32>
    %63 = arith.mulf %53, %62 : vector<2x128xf32>
    %64 = vector.broadcast %41 : vector<1x128xf32> to vector<2x128xf32>
    %65 = arith.mulf %63, %64 : vector<2x128xf32>
    %66 = vector.broadcast %42 : vector<1x128xf32> to vector<2x128xf32>
    %67 = arith.addf %65, %66 : vector<2x128xf32>
    %cst_36 = arith.constant 0.000000e+00 : f32
    %68 = vector.broadcast %cst_36 : f32 to vector<2x128xf32>
    %69 = arith.maximumf %67, %68 : vector<2x128xf32>
    %70 = arith.truncf %69 : vector<2x128xf32> to vector<2x128xbf16>
    %cst_37 = arith.constant dense<0.000000e+00> : vector<2x128xf32>
    %71 = tpu.matmul %70, %44, %cst_37 {dimension_numbers = #tpu.dot_dimension_numbers<[1], [0], [0], [1], [0, 0, 1, 1], [], []>} : vector<2x128xbf16>, vector<128x128xbf16>, vector<2x128xf32> -> vector<2x128xf32>
    %72 = vector.broadcast %45 : vector<1x128xf32> to vector<2x128xf32>
    %73 = arith.addf %71, %72 : vector<2x128xf32>
    %c0_38 = arith.constant 0 : index
    %c0_39 = arith.constant 0 : index
    %74 = vector.load %arg4[%c0_38, %c0_39] : memref<2x384xf32, #tpu.memory_space<vmem>>, vector<2x128xf32>
    tpu.vector_store %arg4[%c0_38, %c0_39], %3 {strides = array<i32>} : memref<2x384xf32, #tpu.memory_space<vmem>>, vector<2x128xf32>,
    %c0_40 = arith.constant 0 : index
    %c128 = arith.constant 128 : index
    %75 = vector.load %arg4[%c0_40, %c128] : memref<2x384xf32, #tpu.memory_space<vmem>>, vector<2x128xf32>
    tpu.vector_store %arg4[%c0_40, %c128], %38 {strides = array<i32>} : memref<2x384xf32, #tpu.memory_space<vmem>>, vector<2x128xf32>,
    %c0_41 = arith.constant 0 : index
    %c256 = arith.constant 256 : index
    %76 = vector.load %arg4[%c0_41, %c256] : memref<2x384xf32, #tpu.memory_space<vmem>>, vector<2x128xf32>
    tpu.vector_store %arg4[%c0_41, %c256], %73 {strides = array<i32>} : memref<2x384xf32, #tpu.memory_space<vmem>>, vector<2x128xf32>,
    return
  }
}

</mosaic_0001>

<bundles_post_ra>
// kernel: forward.1
= control target key start
LH: loop header
LB: loop body
LE: loop exit
PB: predicated region body
PF: predicated region fallthrough
CT: control target
= control target key end

     0   :  { %9 = vsyncpa [#allocation3], 0  ;;  %s1885_s0 = inlined_call_operand.vmem [shape: f32[2,1024], index: 0, kind: input, shape index: {}]   ;;  %s1886_s1 = inlined_call_operand.hbm [shape: bf16[1024,128], index: 1, kind: input, shape index: {}]   ;;  %s1887_s2 = inlined_call_operand.hbm [shape: bf16[4,128,128], index: 2, kind: input, shape index: {}]   ;;  %s1888_s3 = inlined_call_operand.vmem [shape: f32[8,128], index: 3, kind: input, shape index: {}]   ;;  %s1889_s4 = inlined_call_operand.vmem [shape: f32[2,384], index: 4, kind: output, shape index: {}]  }
   0x1   :  { %10 = vsyncpa [#allocation5], 0  ;;  %s1746_s15 = smov [#allocation2]   ;;  %s1698_s19 = scalar_lea.hbm %s1886_s1, 8192 }
   0x2   :  { %s18_s16 = sshll.u32 %s1746_s15, 4  ;;  %p1699_p0 = scmp.ne.s32.totalorder %s1886_s1, %s1698_s19  ;;  %s19_s16 = int_to_ptr.vmem [resolvable:$true] %s18_s16 }
   0x3   :  { %p1702_p1 = scmp.lt.u32.totalorder %s1698_s19, %s1886_s1 }
   0x5   :  { %p1704_p2 = pnand %p1702_p1, %p1699_p0 }
   0x7   :  { %1707 = shalt.err (!%p1704_p2)
}
   0x8   :  { %s1708_s24 = scalar_lea.vmem %s19_s16, 8192  ;;  %p1713_p4 = scmp.lt.s32.totalorder %s19_s16, %s19_s16 }
   0x9   :  { %p1709_p3 = scmp.ne.s32.totalorder %s19_s16, %s1708_s24  ;;  %p1714_p5 = scmp.lt.s32.totalorder %s1708_s24, %s1708_s24 }
   0xb   :  { %p1715_p6 = por %p1714_p5, %p1713_p4 }
   0xd   :  { %p1716_p7 = pnand %p1715_p6, %p1709_p3 }
   0xf   :  { %1719 = shalt.err (!%p1716_p7)
}
  0x10   :  { %s1747_s25 = smov 64   ;;  %s1748_s26 = smov 4  }
  0x11   :  { %24 = dma.hbm_to_vmem [thread:$0]  %s1886_s1, 8192, %s19_s16, [#allocation3], %s1747_s25, %s1747_s25, %s1748_s26  }
  0x12   :  { %s1749_s29 = smov [#allocation4]   ;;  %s1720_s7 = scalar_lea.hbm %s1887_s2, 4096 }
  0x13   :  { %s30_s30 = sshll.u32 %s1749_s29, 4  ;;  %p1721_p8 = scmp.ne.s32.totalorder %s1887_s2, %s1720_s7  ;;  %s31_s30 = int_to_ptr.vmem [resolvable:$true] %s30_s30 }
  0x14   :  { %p1724_p9 = scmp.lt.u32.totalorder %s1720_s7, %s1887_s2 }
  0x16   :  { %p1726_p10 = pnand %p1724_p9, %p1721_p8 }
  0x18   :  { %1729 = shalt.err (!%p1726_p10)
}
  0x19   :  { %s1730_s12 = scalar_lea.vmem %s31_s30, 4096  ;;  %p1735_p12 = scmp.lt.s32.totalorder %s31_s30, %s31_s30 }
  0x1a   :  { %p1731_p11 = scmp.ne.s32.totalorder %s31_s30, %s1730_s12  ;;  %p1736_p13 = scmp.lt.s32.totalorder %s1730_s12, %s1730_s12 }
  0x1c   :  { %p1737_p0 = por %p1736_p13, %p1735_p12 }
  0x1e   :  { %p1738_p1 = pnand %p1737_p0, %p1731_p11 }
  0x20   :  { %1741 = shalt.err (!%p1738_p1)
}
  0x21   :  { %36 = dma.hbm_to_vmem [thread:$0]  %s1887_s2, 4096, %s31_s30, [#allocation5], %s1747_s25, %s1747_s25, %s1748_s26  }
  0x22   :  { %1742 = dma.done.wait [#allocation3], 8192  }
  0x23   :  { %1743 = vsyncadd [#allocation3], 4294959104 }
  0x24   :  { %1744 = dma.done.wait [#allocation5], 4096  }
  0x25   :  { %1745 = vsyncadd [#allocation5], 4294963200  ;;  %v1596_v0 = vld [vmem:[#allocation2 + $0x40] sm:$0xff]   ;;  %v1600_v4 = vld [vmem:[#allocation2 + $0x48] sm:$0xff]   ;;  %v1750_v22 = vmov 1983009808   ;;  %v54_v24 = vlaneseq }
  0x26   :  { %v1597_v1 = vld [vmem:[#allocation2 + $0xc0] sm:$0xff]   ;;  %1385 = vmatprep.subr.bf16.mxu0 %v1596_v0  ;;  %v1601_v5 = vld [vmem:[#allocation2 + $0xc8] sm:$0xff]   ;;  %v1604_v8 = vld [vmem:[#allocation2 + $0x50] sm:$0xff]   ;;  %v52_v23 = vunpack.c.l.s4 %v1750_v22  ;;  %vm1752_vm0 = vmmov 0   ;;  %vm897_vm1 = vcmask 1041408  }
  0x27   :  { %v1598_v2 = vld [vmem:[#allocation2] sm:$0xff]   ;;  %1407 = vmatprep.subr.bf16.mxu1 %v1597_v1  ;;  %v1602_v6 = vld [vmem:[#allocation2 + $0x8] sm:$0xff]   ;;  %v1605_v9 = vld [vmem:[#allocation2 + $0xd0] sm:$0xff]   ;;  %v55_v30 = vshrl.u32 %v54_v24, 7 }
  0x28   :  { %v1599_v3 = vld [vmem:[#allocation2 + $0x80] sm:$0xff]   ;;  %1386 = vmatpush3.bf16.msra.mxu0 %v1598_v2  ;;  %v1603_v7 = vld [vmem:[#allocation2 + $0x88] sm:$0xff]   ;;  %v1606_v10 = vld [vmem:[#allocation2 + $0x10] sm:$0xff]   ;;  %v53_v29 = vunpack.c.0.s8 %v52_v23 }
  0x29   :  { %1408 = vmatpush3.bf16.msra.mxu1 %v1599_v3  ;;  %1387 = vmatprep.subr.bf16.mxu0 %v1600_v4  ;;  %v1607_v11 = vld [vmem:[#allocation2 + $0x90] sm:$0xff]   ;;  %v1608_v12 = vld [vmem:[#allocation2 + $0x58] sm:$0xff]   ;;  %v1612_v16 = vld [vmem:[#allocation2 + $0x60] sm:$0xff]  }
  0x2a   :  { %1409 = vmatprep.subr.bf16.mxu1 %v1601_v5  ;;  %v1609_v13 = vld [vmem:[#allocation2 + $0xd8] sm:$0xff]   ;;  %v1613_v17 = vld [vmem:[#allocation2 + $0xe0] sm:$0xff]   ;;  %v1616_v20 = vld [vmem:[#allocation2 + $0x68] sm:$0xff]   ;;  %v1802_v35 = vsub.s32 %v53_v29, %v55_v30 }
  0x2b   :  { %v1610_v14 = vld [vmem:[#allocation2 + $0x18] sm:$0xff]   ;;  %v1614_v18 = vld [vmem:[#allocation2 + $0x20] sm:$0xff]   ;;  %v1617_v21 = vld [vmem:[#allocation2 + $0xe8] sm:$0xff]  }
  0x2c   :  { %1388 = vmatpush3.bf16.msra.mxu0 %v1602_v6  ;;  %v1611_v15 = vld [vmem:[#allocation2 + $0x98] sm:$0xff]   ;;  %v1615_v19 = vld [vmem:[#allocation2 + $0xa0] sm:$0xff]   ;;  %v1618_v25 = vld [vmem:[#allocation2 + $0x28] sm:$0xff]  }
  0x2d   :  { %1410 = vmatpush3.bf16.msra.mxu1 %v1603_v7  ;;  %1389 = vmatprep.subr.bf16.mxu0 %v1604_v8  ;;  %v1619_v26 = vld [vmem:[#allocation2 + $0xa8] sm:$0xff]   ;;  %v1620_v27 = vld [vmem:[#allocation2 + $0x70] sm:$0xff]   ;;  %v1624_v33 = vld [vmem:[#allocation2 + $0x78] sm:$0xff]  }
  0x2e   :  { %1411 = vmatprep.subr.bf16.mxu1 %v1605_v9  ;;  %v1621_v28 = vld [vmem:[#allocation2 + $0xf0] sm:$0xff]   ;;  %v1625_v34 = vld [vmem:[#allocation2 + $0xf8] sm:$0xff]   ;;  %v46_v38 = vld [vmem:[%s1885_s0] sm:$0xff] }
  0x2f   :  { %v1622_v31 = vld [vmem:[#allocation2 + $0x30] sm:$0xff]   ;;  %v1626_v36 = vld [vmem:[#allocation2 + $0x38] sm:$0xff]   ;;  %v57_v39 = vrot.slane %v46_v38, %v1802_v35  ;;  %v50_v40 = vcombine.high %v46_v38, %v46_v38  ;;  %v1629_v41 = vld [vmem:[#allocation2 + $0x140] sm:$0xff]  }
  0x30   :  { %1390 = vmatpush3.bf16.msra.mxu0 %v1606_v10  ;;  %v1623_v32 = vld [vmem:[#allocation2 + $0xb0] sm:$0xff]   ;;  %v1627_v37 = vld [vmem:[#allocation2 + $0xb8] sm:$0xff]   ;;  %v1630_v42 = vld [vmem:[#allocation2 + $0x1c0] sm:$0xff]  }
  0x31   :  { %1412 = vmatpush3.bf16.msra.mxu1 %v1607_v11  ;;  %1391 = vmatprep.subr.bf16.mxu0 %v1608_v12  ;;  %v65_v43 = vcombine.high %v57_v39, %v57_v39  ;;  %v64_v44 = vrot.slane %v50_v40, %v1802_v35  ;;  %v92_v45 = vpack.c.bf16 %v57_v39, %v57_v39  ;;  %v1631_v46 = vld [vmem:[#allocation2 + $0x100] sm:$0xff]   ;;  %v1633_v51 = vld [vmem:[#allocation2 + $0x148] sm:$0xff]   ;;  %v1637_v56 = vld [vmem:[#allocation2 + $0x150] sm:$0xff]  }
  0x32   :  { %1413 = vmatprep.subr.bf16.mxu1 %v1609_v13  ;;  %v1632_v49 = vld [vmem:[#allocation2 + $0x180] sm:$0xff]   ;;  %v1634_v53 = vld [vmem:[#allocation2 + $0x1c8] sm:$0xff]   ;;  %v1638_v57 = vld [vmem:[#allocation2 + $0x1d0] sm:$0xff]  }
  0x33   :  { %v93_v47 = vpack.c.bf16 %v65_v43, %v65_v43  ;;  %v66_v48 = vcombine.high %v64_v44, %v64_v44  ;;  %v94_v50 = vpack.c.bf16 %v64_v44, %v64_v44  ;;  %v1635_v54 = vld [vmem:[#allocation2 + $0x108] sm:$0xff]   ;;  %v1639_v58 = vld [vmem:[#allocation2 + $0x110] sm:$0xff]   ;;  %v1641_v60 = vld [vmem:[#allocation2 + $0x158] sm:$0xff]  }
  0x34   :  { %1392 = vmatpush3.bf16.msra.mxu0 %v1610_v14  ;;  %v1636_v55 = vld [vmem:[#allocation2 + $0x188] sm:$0xff]   ;;  %v1640_v59 = vld [vmem:[#allocation2 + $0x190] sm:$0xff]   ;;  %v1642_v61 = vld [vmem:[#allocation2 + $0x1d8] sm:$0xff]  }
  0x35   :  { %1414 = vmatpush3.bf16.msra.mxu1 %v1611_v15  ;;  %1393 = vmatprep.subr.bf16.mxu0 %v1612_v16  ;;  %v95_v52 = vpack.c.bf16 %v66_v48, %v66_v48  ;;  %v1643_v62 = vld [vmem:[#allocation2 + $0x118] sm:$0xff]   ;;  %v1645_v0 = vld [vmem:[#allocation2 + $0x160] sm:$0xff]   ;;  %v1649_v4 = vld [vmem:[#allocation2 + $0x168] sm:$0xff]  }
  0x36   :  { %1415 = vmatprep.subr.bf16.mxu1 %v1613_v17  ;;  %644 = vmatprep.mubr.bf16.mxu0 %v93_v47  ;;  %v1644_v63 = vld [vmem:[#allocation2 + $0x198] sm:$0xff]   ;;  %v1646_v1 = vld [vmem:[#allocation2 + $0x1e0] sm:$0xff]   ;;  %v1650_v5 = vld [vmem:[#allocation2 + $0x1e8] sm:$0xff]  }
  0x37   :  { %684 = vmatprep.mubr.bf16.mxu1 %v95_v52  ;;  %v1647_v2 = vld [vmem:[#allocation2 + $0x120] sm:$0xff]   ;;  %v1651_v6 = vld [vmem:[#allocation2 + $0x128] sm:$0xff]   ;;  %v1653_v8 = vld [vmem:[#allocation2 + $0x170] sm:$0xff]  }
  0x38   :  { %1394 = vmatpush3.bf16.msra.mxu0 %v1614_v18  ;;  %v1648_v3 = vld [vmem:[#allocation2 + $0x1a0] sm:$0xff]   ;;  %v1652_v7 = vld [vmem:[#allocation2 + $0x1a8] sm:$0xff]   ;;  %v1654_v9 = vld [vmem:[#allocation2 + $0x1f0] sm:$0xff]  }
  0x39   :  { %1416 = vmatpush3.bf16.msra.mxu1 %v1615_v19  ;;  %1395 = vmatprep.subr.bf16.mxu0 %v1616_v20  ;;  %v1655_v10 = vld [vmem:[#allocation2 + $0x130] sm:$0xff]   ;;  %v1657_v12 = vld [vmem:[#allocation2 + $0x178] sm:$0xff]   ;;  %v47_v15 = vld [vmem:[%s1885_s0 + $0x8] sm:$0xff] }
  0x3a   :  { %1417 = vmatprep.subr.bf16.mxu1 %v1617_v21  ;;  %v1656_v11 = vld [vmem:[#allocation2 + $0x1b0] sm:$0xff]   ;;  %v1658_v13 = vld [vmem:[#allocation2 + $0x1f8] sm:$0xff]   ;;  %v74_v17 = vrot.slane %v47_v15, %v1802_v35  ;;  %v67_v18 = vcombine.high %v47_v15, %v47_v15 }
  0x3b   :  { %v1659_v14 = vld [vmem:[#allocation2 + $0x138] sm:$0xff]   ;;  %v1664_v29 = vld [vmem:[#allocation4 + $0x10] sm:$0xff]  }
  0x3c   :  { %1396 = vmatpush3.bf16.msra.mxu0 %v1618_v25  ;;  %v1660_v16 = vld [vmem:[#allocation2 + $0x1b8] sm:$0xff]   ;;  %v82_v19 = vcombine.high %v74_v17, %v74_v17  ;;  %v81_v20 = vrot.slane %v67_v18, %v1802_v35  ;;  %v96_v21 = vpack.c.bf16 %v74_v17, %v74_v17 }
  0x3d   :  { %1418 = vmatpush3.bf16.msra.mxu1 %v1619_v26  ;;  %1397 = vmatprep.subr.bf16.mxu0 %v1620_v27  ;;  %v1662_v26 = vld [vmem:[#allocation4] sm:$0xff]   ;;  %v1751_v27 = vmov 0.0   ;;  %v1665_v30 = vld [vmem:[#allocation4 + $0x18] sm:$0xff]  }
  0x3e   :  { %1419 = vmatprep.subr.bf16.mxu1 %v1621_v28  ;;  %v97_v22 = vpack.c.bf16 %v82_v19, %v82_v19  ;;  %v83_v23 = vcombine.high %v81_v20, %v81_v20  ;;  %v98_v24 = vpack.c.bf16 %v81_v20, %v81_v20  ;;  %v1663_v28 = vld [vmem:[#allocation4 + $0x8] sm:$0xff]  }
  0x40   :  { %1398 = vmatpush3.bf16.msra.mxu0 %v1622_v31  ;;  %v99_v25 = vpack.c.bf16 %v83_v23, %v83_v23  ;;  %v1666_v31 = vld [vmem:[#allocation4 + $0x20] sm:$0xff]  }
  0x41   :  { %1420 = vmatpush3.bf16.msra.mxu1 %v1623_v32  ;;  %1399 = vmatprep.subr.bf16.mxu0 %v1624_v33  ;;  %v1667_v32 = vld [vmem:[#allocation4 + $0x28] sm:$0xff]   ;;  %v1668_v33 = vld [vmem:[#allocation4 + $0x30] sm:$0xff]  }
  0x42   :  { %1421 = vmatprep.subr.bf16.mxu1 %v1625_v34  ;;  %v1669_v34 = vld [vmem:[#allocation4 + $0x38] sm:$0xff]  }
  0x44   :  { %1400 = vmatpush3.bf16.msra.mxu0 %v1626_v36 }
  0x45   :  { %1422 = vmatpush3.bf16.msra.mxu1 %v1627_v37  ;;  %1429 = vmatprep.subr.bf16.mxu0 %v1629_v41 }
  0x46   :  { %1451 = vmatprep.subr.bf16.mxu1 %v1630_v42 }
  0x47   :  { %645 = vmatmul.mubr.bf16.vlgmr.msra.gmra.mrb[0].mxu0 %v92_v45 }
  0x48   :  { %1430 = vmatpush3.bf16.msra.mxu0 %v1631_v46  ;;  %685 = vmatmul.mubr.bf16.vlgmr.msra.gmra.mrb[0].mxu1 %v94_v50 }
  0x49   :  { %1431 = vmatprep.subr.bf16.mxu0 %v1633_v51  ;;  %1452 = vmatpush3.bf16.msra.mxu1 %v1632_v49 }
  0x4a   :  { %1453 = vmatprep.subr.bf16.mxu1 %v1634_v53  ;;  %724 = vmatprep.mubr.bf16.mxu0 %v97_v22 }
  0x4b   :  { %764 = vmatprep.mubr.bf16.mxu1 %v99_v25 }
  0x4c   :  { %1432 = vmatpush3.bf16.msra.mxu0 %v1635_v54 }
  0x4d   :  { %1433 = vmatprep.subr.bf16.mxu0 %v1637_v56  ;;  %1454 = vmatpush3.bf16.msra.mxu1 %v1636_v55 }
  0x4e   :  { %1455 = vmatprep.subr.bf16.mxu1 %v1638_v57 }
  0x50   :  { %1434 = vmatpush3.bf16.msra.mxu0 %v1639_v58 }
  0x51   :  { %1435 = vmatprep.subr.bf16.mxu0 %v1641_v60  ;;  %1456 = vmatpush3.bf16.msra.mxu1 %v1640_v59  ;;  %v1670_v59 = vld [vmem:[#allocation4 + $0x40] sm:$0xff]   ;;  %v1671_v60 = vld [vmem:[#allocation4 + $0x48] sm:$0xff]  }
  0x52   :  { %1457 = vmatprep.subr.bf16.mxu1 %v1642_v61  ;;  %v1672_v61 = vld [vmem:[#allocation4 + $0x50] sm:$0xff]  }
  0x54   :  { %1436 = vmatpush3.bf16.msra.mxu0 %v1643_v62  ;;  %v1673_v62 = vld [vmem:[#allocation4 + $0x58] sm:$0xff]  }
  0x55   :  { %1437 = vmatprep.subr.bf16.mxu0 %v1645_v0  ;;  %1458 = vmatpush3.bf16.msra.mxu1 %v1644_v63  ;;  %v1674_v63 = vld [vmem:[#allocation4 + $0x60] sm:$0xff]   ;;  %v1675_v0 = vld [vmem:[#allocation4 + $0x68] sm:$0xff]  }
  0x56   :  { %1459 = vmatprep.subr.bf16.mxu1 %v1646_v1  ;;  %v1676_v1 = vld [vmem:[#allocation4 + $0x70] sm:$0xff]  }
  0x58   :  { %1438 = vmatpush3.bf16.msra.mxu0 %v1647_v2  ;;  %v1677_v2 = vld [vmem:[#allocation4 + $0x78] sm:$0xff]  }
  0x59   :  { %1439 = vmatprep.subr.bf16.mxu0 %v1649_v4  ;;  %1460 = vmatpush3.bf16.msra.mxu1 %v1648_v3  ;;  %v1678_v3 = vld [vmem:[#allocation4 + $0x80] sm:$0xff]   ;;  %v1679_v4 = vld [vmem:[#allocation4 + $0x88] sm:$0xff]  }
  0x5a   :  { %1461 = vmatprep.subr.bf16.mxu1 %v1650_v5  ;;  %v1680_v5 = vld [vmem:[#allocation4 + $0x90] sm:$0xff]  }
  0x5c   :  { %1440 = vmatpush3.bf16.msra.mxu0 %v1651_v6  ;;  %v1681_v6 = vld [vmem:[#allocation4 + $0x98] sm:$0xff]  }
  0x5d   :  { %1441 = vmatprep.subr.bf16.mxu0 %v1653_v8  ;;  %1462 = vmatpush3.bf16.msra.mxu1 %v1652_v7  ;;  %v1682_v7 = vld [vmem:[#allocation4 + $0xa0] sm:$0xff]   ;;  %v1683_v8 = vld [vmem:[#allocation4 + $0xa8] sm:$0xff]  }
  0x5e   :  { %1463 = vmatprep.subr.bf16.mxu1 %v1654_v9  ;;  %v1684_v9 = vld [vmem:[#allocation4 + $0xb0] sm:$0xff]  }
  0x60   :  { %1442 = vmatpush3.bf16.msra.mxu0 %v1655_v10 }
  0x61   :  { %1443 = vmatprep.subr.bf16.mxu0 %v1657_v12  ;;  %1464 = vmatpush3.bf16.msra.mxu1 %v1656_v11 }
  0x62   :  { %1465 = vmatprep.subr.bf16.mxu1 %v1658_v13 }
  0x64   :  { %1444 = vmatpush3.bf16.msra.mxu0 %v1659_v14 }
  0x65   :  { %1466 = vmatpush3.bf16.msra.mxu1 %v1660_v16  ;;  %1509 = vmatprep.subr.bf16.mxu0 %v1751_v27 }
  0x66   :  { %1529 = vmatprep.subr.bf16.mxu1 %v1751_v27 }
  0x67   :  { %725 = vmatmul.mubr.bf16.vlgmr.msra.gmra.mrb[4].mxu0 %v96_v21 }
  0x68   :  { %765 = vmatmul.mubr.bf16.vlgmr.msra.gmra.mrb[4].mxu1 %v98_v24  ;;  %1510 = vmatpush3.bf16.msra.mxu0 %v1662_v26 }
  0x69   :  { %1511 = vmatprep.subr.bf16.mxu0 %v1751_v27  ;;  %1525 = vmatprep.mubr.msk.bf16.mxu0 %vm1752_vm0, %v1751_v27 }
  0x6a   :  { %1545 = vmatprep.mubr.msk.bf16.mxu1 %vm1752_vm0, %v1751_v27  ;;  %1530 = vmatpush3.bf16.msra.mxu1 %v1670_v59 }
  0x6b   :  { %1531 = vmatprep.subr.bf16.mxu1 %v1751_v27 }
  0x6c   :  { %1512 = vmatpush3.bf16.msra.mxu0 %v1663_v28 }
  0x6d   :  { %1513 = vmatprep.subr.bf16.mxu0 %v1751_v27 }
  0x6e   :  { %1532 = vmatpush3.bf16.msra.mxu1 %v1671_v60 }
  0x6f   :  { %1533 = vmatprep.subr.bf16.mxu1 %v1751_v27 }
  0x70   :  { %1514 = vmatpush3.bf16.msra.mxu0 %v1664_v29 }
  0x71   :  { %1515 = vmatprep.subr.bf16.mxu0 %v1751_v27 }
  0x72   :  { %1534 = vmatpush3.bf16.msra.mxu1 %v1672_v61 }
  0x73   :  { %1535 = vmatprep.subr.bf16.mxu1 %v1751_v27 }
  0x74   :  { %1516 = vmatpush3.bf16.msra.mxu0 %v1665_v30 }
  0x75   :  { %1517 = vmatprep.subr.bf16.mxu0 %v1751_v27 }
  0x76   :  { %1536 = vmatpush3.bf16.msra.mxu1 %v1673_v62 }
  0x77   :  { %1537 = vmatprep.subr.bf16.mxu1 %v1751_v27 }
  0x78   :  { %1518 = vmatpush3.bf16.msra.mxu0 %v1666_v31 }
  0x79   :  { %1519 = vmatprep.subr.bf16.mxu0 %v1751_v27 }
  0x7a   :  { %1538 = vmatpush3.bf16.msra.mxu1 %v1674_v63 }
  0x7b   :  { %1539 = vmatprep.subr.bf16.mxu1 %v1751_v27 }
  0x7c   :  { %1520 = vmatpush3.bf16.msra.mxu0 %v1667_v32 }
  0x7d   :  { %1521 = vmatprep.subr.bf16.mxu0 %v1751_v27 }
  0x7e   :  { %1540 = vmatpush3.bf16.msra.mxu1 %v1675_v0 }
  0x7f   :  { %1541 = vmatprep.subr.bf16.mxu1 %v1751_v27 }
  0x80   :  { %1522 = vmatpush3.bf16.msra.mxu0 %v1668_v33 }
  0x81   :  { %1523 = vmatprep.subr.bf16.mxu0 %v1751_v27 }
  0x82   :  { %1542 = vmatpush3.bf16.msra.mxu1 %v1676_v1 }
  0x83   :  { %1543 = vmatprep.subr.bf16.mxu1 %v1751_v27 }
  0x84   :  { %1524 = vmatpush3.bf16.msra.mxu0 %v1669_v34 }
  0x85   :  { %1549 = vmatprep.subr.bf16.mxu0 %v1751_v27 }
  0x86   :  { %1544 = vmatpush3.bf16.msra.mxu1 %v1677_v2 }
  0x87   :  { %1569 = vmatprep.subr.bf16.mxu1 %v1751_v27 }
 0x11a   :  { %v1401_v35 = vpop.f32.mrb[0].mxu0 }
 0x11b   :  { %v1402_v36 = vpop.f32.mrb[1].mxu0  ;;  %v1423_v37 = vpop.f32.mrb[0].mxu1 }
 0x11c   :  { %v1403_v38 = vadd.f32 %v1402_v36, %v1401_v35  ;;  %v1404_v39 = vpop.f32.mrb[2].mxu0  ;;  %v1424_v40 = vpop.f32.mrb[1].mxu1  ;;  %v1355_v35 = vld [vmem:[%s1888_s3] ss:$0 sm:$0xff] }
 0x11d   :  { %v1405_v41 = vpop.f32.mrb[3].mxu0  ;;  %v1425_v42 = vadd.f32 %v1424_v40, %v1423_v37  ;;  %v1426_v43 = vpop.f32.mrb[2].mxu1  ;;  %v1356_v37 = vld [vmem:[%s1888_s3 + $0x1] ss:$0 sm:$0xff] }
 0x11e   :  { %v1427_v44 = vpop.f32.mrb[3].mxu1  ;;  %v1357_v43 = vld [vmem:[%s1888_s3 + $0x2] ss:$0 sm:$0xff] }
 0x11f   :  { %v687_v45 = vadd.f32 %v1425_v42, %v1403_v38  ;;  %v1685_v42 = vld [vmem:[#allocation4 + $0xb8] sm:$0xff]  }
 0x13a   :  { %v1445_v46 = vpop.f32.mrb[4].mxu0 }
 0x13b   :  { %v1446_v47 = vpop.f32.mrb[5].mxu0  ;;  %v1467_v48 = vpop.f32.mrb[4].mxu1 }
 0x13c   :  { %v1447_v49 = vadd.f32 %v1446_v47, %v1445_v46  ;;  %v1448_v50 = vpop.f32.mrb[6].mxu0  ;;  %v1468_v51 = vpop.f32.mrb[5].mxu1 }
 0x13d   :  { %v1449_v52 = vpop.f32.mrb[7].mxu0  ;;  %v1469_v54 = vadd.f32 %v1468_v51, %v1467_v48  ;;  %v1470_v55 = vpop.f32.mrb[6].mxu1  ;;  %v1686_v50 = vld [vmem:[#allocation4 + $0xc0] sm:$0xff]   ;;  %v1687_v51 = vld [vmem:[#allocation4 + $0xc8] sm:$0xff]  }
 0x13e   :  { %v727_v53 = vadd.f32 %v1447_v49, %v687_v45  ;;  %v1471_v56 = vpop.f32.mrb[7].mxu1  ;;  %v1688_v52 = vld [vmem:[#allocation4 + $0xd0] sm:$0xff]   ;;  %v1691_v55 = vld [vmem:[#allocation4 + $0xe8] sm:$0xff]  }
 0x13f   :  { %v1692_v56 = vld [vmem:[#allocation4 + $0xf0] sm:$0xff]  }
 0x140   :  { %v767_v57 = vadd.f32 %v1469_v54, %v727_v53  ;;  %v1689_v53 = vld [vmem:[#allocation4 + $0xd8] sm:$0xff]   ;;  %v1690_v54 = vld [vmem:[#allocation4 + $0xe0] sm:$0xff]  }
 0x142   :  { %v808_v58 = vpack.c.bf16 %v767_v57, %v767_v57  ;;  %1274 = vst [vmem:[%s1889_s4] sm:$0x3] %v767_v57  ;;  %v1693_v57 = vld [vmem:[#allocation4 + $0xf8] sm:$0xff]  }
 0x144   :  { %1526 = vmatmul.mubr.bf16.vlgmr.msra.gmra.mrb[8].mxu0 %v808_v58 }
 0x145   :  { %1565 = vmatprep.mubr.msk.bf16.mxu0 %vm1752_vm0, %v1751_v27  ;;  %1550 = vmatpush3.bf16.msra.mxu0 %v1678_v3 }
 0x146   :  { %1551 = vmatprep.subr.bf16.mxu0 %v1751_v27 }
 0x149   :  { %1552 = vmatpush3.bf16.msra.mxu0 %v1679_v4 }
 0x14a   :  { %1553 = vmatprep.subr.bf16.mxu0 %v1751_v27 }
 0x14d   :  { %1554 = vmatpush3.bf16.msra.mxu0 %v1680_v5 }
 0x14e   :  { %1555 = vmatprep.subr.bf16.mxu0 %v1751_v27 }
 0x151   :  { %1556 = vmatpush3.bf16.msra.mxu0 %v1681_v6 }
 0x152   :  { %1557 = vmatprep.subr.bf16.mxu0 %v1751_v27 }
 0x155   :  { %1558 = vmatpush3.bf16.msra.mxu0 %v1682_v7 }
 0x156   :  { %1559 = vmatprep.subr.bf16.mxu0 %v1751_v27 }
 0x159   :  { %1560 = vmatpush3.bf16.msra.mxu0 %v1683_v8 }
 0x15a   :  { %1561 = vmatprep.subr.bf16.mxu0 %v1751_v27 }
 0x15d   :  { %1562 = vmatpush3.bf16.msra.mxu0 %v1684_v9 }
 0x15e   :  { %1563 = vmatprep.subr.bf16.mxu0 %v1751_v27 }
 0x161   :  { %1564 = vmatpush3.bf16.msra.mxu0 %v1685_v42 }
 0x217   :  { %v891_v10 = vpop.f32.mrb[8].mxu0 }
 0x218   :  { %v898_v11 = vsel %vm897_vm1, %v891_v10, 0.0  ;;  %v1527_v12 = vpop.f32.mrb[9].mxu0 }
 0x219   :  { %v899_v13 = vrot.slane %v898_v11, 4  ;;  %v894_v14 = vpop.f32.mrb[10].mxu0 }
 0x21a   :  { %v1528_v15 = vpop.f32.mrb[11].mxu0 }
 0x21b   :  { %v900_v16 = vadd.f32 %v899_v13, %v898_v11 }
 0x21d   :  { %v901_v17 = vrot.slane %v900_v16, 2 }
 0x21f   :  { %v902_v18 = vadd.f32 %v901_v17, %v900_v16  ;;  %v1374_v17 = vld [vmem:[%s1888_s3 + $0x3] ss:$0 sm:$0xff] }
 0x221   :  { %v903_v19 = vrot.slane %v902_v18, 1 }
 0x223   :  { %v904_v20 = vadd.f32 %v903_v19, %v902_v18  ;;  %v1375_v19 = vld [vmem:[%s1888_s3 + $0x4] ss:$0 sm:$0xff] }
 0x225   :  { %v905_v21 = vmul.f32 0.5, %v904_v20 }
 0x227   :  { %v906_v22 = vsub.f32 %v891_v10, %v905_v21 }
 0x229   :  { %v907_v23 = vmul.f32 %v906_v22, %v906_v22 }
 0x22b   :  { %v908_v24 = vsel %vm897_vm1, %v907_v23, 0.0 }
 0x22c   :  { %v909_v25 = vrot.slane %v908_v24, 4 }
 0x22e   :  { %v910_v26 = vadd.f32 %v909_v25, %v908_v24  ;;  %v1376_v24 = vld [vmem:[%s1888_s3 + $0x5] ss:$0 sm:$0xff] }
 0x230   :  { %v911_v28 = vrot.slane %v910_v26, 2 }
 0x232   :  { %v912_v29 = vadd.f32 %v911_v28, %v910_v26 }
 0x234   :  { %v913_v30 = vrot.slane %v912_v29, 1 }
 0x236   :  { %v914_v31 = vadd.f32 %v913_v30, %v912_v29 }
 0x238   :  { %v915_v32 = vmul.f32 0.5, %v914_v31 }
 0x23a   :  { %v916_v33 = vadd.f32 1e-05, %v915_v32 }
 0x23c   :  { %1694 = vrsqrt.f32 %v916_v33 }
 0x246   :  { %v1695_v34 = vpop.eup %1694 }
 0x247   :  { %v918_v36 = vmul.f32 %v1695_v34, %v906_v22 }
 0x249   :  { %v923_v38 = vmul.f32 %v1355_v35, %v918_v36 }
 0x24b   :  { %v928_v39 = vadd.f32 %v1356_v37, %v923_v38 }
 0x24d   :  { %v929_v40 = vmax.f32 %v928_v39, 0.0 }
 0x24f   :  { %v930_v41 = vpack.c.bf16 %v929_v40, %v929_v40 }
 0x251   :  { %1546 = vmatmul.mubr.bf16.vlgmr.msra.gmra.mrb[8].mxu1 %v930_v41 }
 0x252   :  { %1585 = vmatprep.mubr.msk.bf16.mxu1 %vm1752_vm0, %v1751_v27  ;;  %1570 = vmatpush3.bf16.msra.mxu1 %v1686_v50 }
 0x253   :  { %1571 = vmatprep.subr.bf16.mxu1 %v1751_v27 }
 0x256   :  { %1572 = vmatpush3.bf16.msra.mxu1 %v1687_v51 }
 0x257   :  { %1573 = vmatprep.subr.bf16.mxu1 %v1751_v27 }
 0x25a   :  { %1574 = vmatpush3.bf16.msra.mxu1 %v1688_v52 }
 0x25b   :  { %1575 = vmatprep.subr.bf16.mxu1 %v1751_v27 }
 0x25e   :  { %1576 = vmatpush3.bf16.msra.mxu1 %v1689_v53 }
 0x25f   :  { %1577 = vmatprep.subr.bf16.mxu1 %v1751_v27 }
 0x262   :  { %1578 = vmatpush3.bf16.msra.mxu1 %v1690_v54 }
 0x263   :  { %1579 = vmatprep.subr.bf16.mxu1 %v1751_v27 }
 0x266   :  { %1580 = vmatpush3.bf16.msra.mxu1 %v1691_v55 }
 0x267   :  { %1581 = vmatprep.subr.bf16.mxu1 %v1751_v27 }
 0x26a   :  { %1582 = vmatpush3.bf16.msra.mxu1 %v1692_v56 }
 0x26b   :  { %1583 = vmatprep.subr.bf16.mxu1 %v1751_v27 }
 0x26e   :  { %1584 = vmatpush3.bf16.msra.mxu1 %v1693_v57 }
 0x324   :  { %v1017_v44 = vpop.f32.mrb[8].mxu1 }
 0x325   :  { %v1018_v45 = vadd.f32 %v1357_v43, %v1017_v44  ;;  %v1547_v46 = vpop.f32.mrb[9].mxu1 }
 0x326   :  { %v1020_v47 = vpop.f32.mrb[10].mxu1 }
 0x327   :  { %v1060_v48 = vpack.c.bf16 %v1018_v45, %v1018_v45  ;;  %1275 = vst [vmem:[%s1889_s4 + $0x2] sm:$0x3] %v1018_v45  ;;  %v1548_v49 = vpop.f32.mrb[11].mxu1 }
 0x329   :  { %1566 = vmatmul.mubr.bf16.vlgmr.msra.gmra.mrb[12].mxu0 %v1060_v48 }
 0x3fc   :  { %v1143_v58 = vpop.f32.mrb[12].mxu0 }
 0x3fd   :  { %v1149_v59 = vsel %vm897_vm1, %v1143_v58, 0.0  ;;  %v1567_v60 = vpop.f32.mrb[13].mxu0 }
 0x3fe   :  { %v1150_v61 = vrot.slane %v1149_v59, 4  ;;  %v1146_v62 = vpop.f32.mrb[14].mxu0 }
 0x3ff   :  { %v1568_v63 = vpop.f32.mrb[15].mxu0 }
 0x400   :  { %v1151_v0 = vadd.f32 %v1150_v61, %v1149_v59 }
 0x402   :  { %v1152_v1 = vrot.slane %v1151_v0, 2 }
 0x404   :  { %v1153_v2 = vadd.f32 %v1152_v1, %v1151_v0 }
 0x406   :  { %v1154_v3 = vrot.slane %v1153_v2, 1 }
 0x408   :  { %v1155_v4 = vadd.f32 %v1154_v3, %v1153_v2 }
 0x40a   :  { %v1156_v5 = vmul.f32 0.5, %v1155_v4 }
 0x40c   :  { %v1157_v6 = vsub.f32 %v1143_v58, %v1156_v5 }
 0x40e   :  { %v1158_v7 = vmul.f32 %v1157_v6, %v1157_v6 }
 0x410   :  { %v1159_v8 = vsel %vm897_vm1, %v1158_v7, 0.0 }
 0x411   :  { %v1160_v9 = vrot.slane %v1159_v8, 4 }
 0x413   :  { %v1161_v27 = vadd.f32 %v1160_v9, %v1159_v8 }
 0x415   :  { %v1162_v10 = vrot.slane %v1161_v27, 2 }
 0x417   :  { %v1163_v11 = vadd.f32 %v1162_v10, %v1161_v27 }
 0x419   :  { %v1164_v12 = vrot.slane %v1163_v11, 1 }
 0x41b   :  { %v1165_v13 = vadd.f32 %v1164_v12, %v1163_v11 }
 0x41d   :  { %v1166_v14 = vmul.f32 0.5, %v1165_v13 }
 0x41f   :  { %v1167_v15 = vadd.f32 1e-05, %v1166_v14 }
 0x421   :  { %1696 = vrsqrt.f32 %v1167_v15 }
 0x42b   :  { %v1697_v16 = vpop.eup %1696 }
 0x42c   :  { %v1169_v18 = vmul.f32 %v1697_v16, %v1157_v6 }
 0x42e   :  { %v1174_v20 = vmul.f32 %v1374_v17, %v1169_v18 }
 0x430   :  { %v1179_v21 = vadd.f32 %v1375_v19, %v1174_v20 }
 0x432   :  { %v1180_v22 = vmax.f32 %v1179_v21, 0.0 }
 0x434   :  { %v1181_v23 = vpack.c.bf16 %v1180_v22, %v1180_v22 }
 0x436   :  { %1586 = vmatmul.mubr.bf16.vlgmr.msra.gmra.mrb[12].mxu1 %v1181_v23 }
 0x509   :  { %v1268_v25 = vpop.f32.mrb[12].mxu1 }
 0x50a   :  { %v1269_v26 = vadd.f32 %v1376_v24, %v1268_v25  ;;  %v1587_v28 = vpop.f32.mrb[13].mxu1 }
 0x50b   :  { %v1271_v29 = vpop.f32.mrb[14].mxu1 }
 0x50c   :  { %1276 = vst [vmem:[%s1889_s4 + $0x4] sm:$0x3] %v1269_v26  ;;  %v1588_v30 = vpop.f32.mrb[15].mxu1 }
 0x50d   :  { %1281 = vsyncpa [#allocation3], 1 }
 0x50e   :  { %1282 = vsyncpa [#allocation5], 1 }

</bundles_post_ra>
